<compile_context>
chip_gen: v5e
topology: v5e:2x2
jax: 0.10.0
libtpu: 0.0.40
codegen_flags: <defaults>
</compile_context>

<pallas_src>
import functools
import math

import jax
import jax.numpy as jnp
from jax import lax
from jax.experimental import pallas as pl
from jax.experimental.pallas import tpu as pltpu


def _round_up(x, m):
    return ((x + m - 1) // m) * m


def ffn_kernel(x_ref, w1_ref, b1_ref, w2_ref, b2_ref, o_ref, acc_ref):
    # x_ref:  (tm, Dp) bf16   row tile (resident across the H axis)
    # w1_ref: (th, Dp) bf16   W1 chunk, PyTorch (out, in) layout -> trans_b matmul
    # b1_ref: (1, th)  f32
    # w2_ref: (Dp, th) bf16   W2 chunk
    # b2_ref: (1, Dp)  f32
    # o_ref:  (tm, Dp) f32
    # acc_ref:(tm, Dp) f32    VMEM accumulator across H chunks
    hk = pl.program_id(1)

    @pl.when(hk == 0)
    def _():
        acc_ref[...] = jnp.zeros_like(acc_ref)

    # layer1 chunk: (tm, Dp) x (th, Dp)^T -> (tm, th); bf16 MXU, f32 accumulate.
    h = lax.dot_general(
        x_ref[...], w1_ref[...],
        dimension_numbers=(((1,), (1,)), ((), ())),
        preferred_element_type=jnp.float32)
    h = jnp.maximum(h + b1_ref[...], 0.0)            # bias + ReLU in f32 (VPU)

    # layer2 partial sum: (tm, th) x (Dp, th)^T -> (tm, Dp), accumulated over H chunks.
    acc_ref[...] += lax.dot_general(
        h.astype(jnp.bfloat16), w2_ref[...],
        dimension_numbers=(((1,), (1,)), ((), ())),
        preferred_element_type=jnp.float32)

    @pl.when(hk == pl.num_programs(1) - 1)
    def _():
        o_ref[...] = (acc_ref[...] + b2_ref[...]).astype(o_ref.dtype)


@functools.partial(jax.jit, static_argnames=("tm_max", "th_max"))
def forward_layer(x, w1, b1, w2, b2, *, tm_max=256, th_max=512):
    """x: (B, S, D). w1: (H, D), b1: (H,), w2: (D, H), b2: (D,) — PyTorch Linear layout."""
    B, S, D = x.shape
    H = w1.shape[0]
    M = B * S

    # Lane-dense padding: feature dims to multiples of 128, rows to the row tile.
    Dp = _round_up(D, 128)
    Hp = _round_up(H, 128)
    tm = min(tm_max, _round_up(M, 8))
    th = min(th_max, Hp)
    Mp = _round_up(M, tm)

    x_p = jnp.pad(x.reshape(M, D), ((0, Mp - M), (0, Dp - D))).astype(jnp.bfloat16)
    w1_p = jnp.pad(w1, ((0, Hp - H), (0, Dp - D))).astype(jnp.bfloat16)   # (Hp, Dp)
    w2_p = jnp.pad(w2, ((0, Dp - D), (0, Hp - H))).astype(jnp.bfloat16)   # (Dp, Hp)
    b1_p = jnp.pad(b1, (0, Hp - H)).reshape(1, Hp).astype(jnp.float32)
    b2_p = jnp.pad(b2, (0, Dp - D)).reshape(1, Dp).astype(jnp.float32)

    grid = (Mp // tm, Hp // th)

    out_p = pl.pallas_call(
        ffn_kernel,
        out_shape=jax.ShapeDtypeStruct((Mp, Dp), jnp.float32),
        grid_spec=pltpu.PrefetchScalarGridSpec(
            num_scalar_prefetch=0,
            grid=grid,
            in_specs=[
                pl.BlockSpec((tm, Dp), lambda i, hk: (i, 0)),    # x row tile (resident over hk)
                pl.BlockSpec((th, Dp), lambda i, hk: (hk, 0)),   # W1 H-chunk
                pl.BlockSpec((1, th), lambda i, hk: (0, hk)),    # b1 H-chunk
                pl.BlockSpec((Dp, th), lambda i, hk: (0, hk)),   # W2 H-chunk
                pl.BlockSpec((1, Dp), lambda i, hk: (0, 0)),     # b2 (grid-invariant)
            ],
            out_specs=pl.BlockSpec((tm, Dp), lambda i, hk: (i, 0)),
            scratch_shapes=[pltpu.VMEM((tm, Dp), jnp.float32)],
        ),
        compiler_params=pltpu.CompilerParams(
            dimension_semantics=("parallel", "arbitrary"),
            vmem_limit_bytes=32 * 1024 * 1024,
        ),
        cost_estimate=pl.CostEstimate(
            flops=4 * Mp * Dp * Hp,
            transcendentals=0,
            bytes_accessed=(x_p.size * 2 + w1_p.size * 2 + w2_p.size * 2
                            + b1_p.size * 4 + b2_p.size * 4 + Mp * Dp * 4),
        ),
    )(x_p, w1_p, b1_p, w2_p, b2_p)

    return out_p[:M, :D].reshape(B, S, D).astype(x.dtype)


def init_linear_params(key, out_features, in_features):
    # Deterministic init mimicking torch.nn.Linear default (uniform +/- 1/sqrt(fan_in))
    kw, kb = jax.random.split(key)
    bound = 1.0 / math.sqrt(in_features)
    w = jax.random.uniform(kw, (out_features, in_features), jnp.float32, -bound, bound)
    b = jax.random.uniform(kb, (out_features,), jnp.float32, -bound, bound)
    return w, b


if __name__ == "__main__":
    key = jax.random.PRNGKey(0)
    k_x, k_l1, k_l2 = jax.random.split(key, 3)

    B, S = 2, 8
    dim_input, dim_inter = 32, 64

    x = jax.random.normal(k_x, (B, S, dim_input), jnp.float32)
    w1, b1 = init_linear_params(k_l1, dim_inter, dim_input)   # layer1: D -> H
    w2, b2 = init_linear_params(k_l2, dim_input, dim_inter)   # layer2: H -> D

    out = forward_layer(x, w1, b1, w2, b2)
    jax.block_until_ready(out)

    # Reference check in plain JAX (tolerance accounts for bf16 MXU operands).
    ref = jnp.maximum(x @ w1.T + b1, 0.0) @ w2.T + b2
    assert out.shape == (B, S, dim_input)
    assert jnp.allclose(out, ref, atol=2e-2, rtol=2e-2), float(jnp.max(jnp.abs(out - ref)))

    print("KERNEL_OK")
</pallas_src>

<mosaic_0001>
module attributes {stable_mosaic.version = 11 : i64} {
  func.func @ffn_kernel(%arg0: i32, %arg1: i32, %arg2: memref<16x128xbf16, #tpu.memory_space<vmem>>, %arg3: memref<128x128xbf16, #tpu.memory_space<vmem>>, %arg4: memref<1x128xf32, #tpu.memory_space<vmem>>, %arg5: memref<128x128xbf16, #tpu.memory_space<vmem>>, %arg6: memref<1x128xf32, #tpu.memory_space<vmem>>, %arg7: memref<16x128xf32, #tpu.memory_space<vmem>>, %arg8: memref<16x128xf32, #tpu.memory_space<vmem>>) attributes {dimension_semantics = [#tpu.dimension_semantics<parallel>, #tpu.dimension_semantics<arbitrary>], iteration_bounds = array<i64: 1, 1>, scalar_prefetch = 0 : i64, scratch_operands = 1 : i64, tpu.core_type = #tpu.core_type<tc>, window_params = [{transform_indices = @transform_0, window_bounds = array<i64: 16, 128>}, {transform_indices = @transform_1, window_bounds = array<i64: 128, 128>}, {transform_indices = @transform_2, window_bounds = array<i64: 1, 128>}, {transform_indices = @transform_3, window_bounds = array<i64: 128, 128>}, {pipeline_mode = #tpu.pipeline_mode<synchronous>, transform_indices = @transform_4, window_bounds = array<i64: 1, 128>}, {transform_indices = @transform_5, window_bounds = array<i64: 16, 128>}]} {
    %c0_i32 = arith.constant 0 : i32
    %0 = arith.cmpi eq, %arg1, %c0_i32 : i32
    %1 = arith.extui %0 : i1 to i32
    %c0_i32_0 = arith.constant 0 : i32
    %2 = arith.cmpi ne, %1, %c0_i32_0 : i32
    scf.if %2 {
      %cst_16 = arith.constant 0.000000e+00 : f32
      %20 = vector.broadcast %cst_16 : f32 to vector<16x128xf32>
      %c0_17 = arith.constant 0 : index
      %c0_18 = arith.constant 0 : index
      %21 = vector.load %arg8[%c0_17, %c0_18] : memref<16x128xf32, #tpu.memory_space<vmem>>, vector<16x128xf32>
      tpu.vector_store %arg8[%c0_17, %c0_18], %20 {strides = array<i32>} : memref<16x128xf32, #tpu.memory_space<vmem>>, vector<16x128xf32>,
    } else {
    }
    %c0 = arith.constant 0 : index
    %c0_1 = arith.constant 0 : index
    %3 = vector.load %arg2[%c0, %c0_1] : memref<16x128xbf16, #tpu.memory_space<vmem>>, vector<16x128xbf16>
    %c0_2 = arith.constant 0 : index
    %c0_3 = arith.constant 0 : index
    %4 = vector.load %arg3[%c0_2, %c0_3] : memref<128x128xbf16, #tpu.memory_space<vmem>>, vector<128x128xbf16>
    %cst = arith.constant dense<0.000000e+00> : vector<16x128xf32>
    %5 = tpu.matmul %3, %4, %cst {dimension_numbers = #tpu.dot_dimension_numbers<[1], [1], [0], [0], [0, 0, 1, 0], [], []>} : vector<16x128xbf16>, vector<128x128xbf16>, vector<16x128xf32> -> vector<16x128xf32>
    %c0_4 = arith.constant 0 : index
    %c0_5 = arith.constant 0 : index
    %6 = vector.load %arg4[%c0_4, %c0_5] : memref<1x128xf32, #tpu.memory_space<vmem>>, vector<1x128xf32>
    %7 = vector.broadcast %6 : vector<1x128xf32> to vector<16x128xf32>
    %8 = arith.addf %5, %7 : vector<16x128xf32>
    %cst_6 = arith.constant 0.000000e+00 : f32
    %9 = vector.broadcast %cst_6 : f32 to vector<16x128xf32>
    %10 = arith.maximumf %8, %9 : vector<16x128xf32>
    %c0_7 = arith.constant 0 : index
    %c0_8 = arith.constant 0 : index
    %11 = vector.load %arg8[%c0_7, %c0_8] : memref<16x128xf32, #tpu.memory_space<vmem>>, vector<16x128xf32>
    %12 = arith.truncf %10 : vector<16x128xf32> to vector<16x128xbf16>
    %c0_9 = arith.constant 0 : index
    %c0_10 = arith.constant 0 : index
    %13 = vector.load %arg5[%c0_9, %c0_10] : memref<128x128xbf16, #tpu.memory_space<vmem>>, vector<128x128xbf16>
    %cst_11 = arith.constant dense<0.000000e+00> : vector<16x128xf32>
    %14 = tpu.matmul %12, %13, %cst_11 {dimension_numbers = #tpu.dot_dimension_numbers<[1], [1], [0], [0], [0, 0, 1, 0], [], []>} : vector<16x128xbf16>, vector<128x128xbf16>, vector<16x128xf32> -> vector<16x128xf32>
    %15 = arith.addf %11, %14 : vector<16x128xf32>
    %c0_12 = arith.constant 0 : index
    %c0_13 = arith.constant 0 : index
    %16 = vector.load %arg8[%c0_12, %c0_13] : memref<16x128xf32, #tpu.memory_space<vmem>>, vector<16x128xf32>
    tpu.vector_store %arg8[%c0_12, %c0_13], %15 {strides = array<i32>} : memref<16x128xf32, #tpu.memory_space<vmem>>, vector<16x128xf32>,
    %c0_i32_14 = arith.constant 0 : i32
    %17 = arith.cmpi eq, %arg1, %c0_i32_14 : i32
    %18 = arith.extui %17 : i1 to i32
    %c0_i32_15 = arith.constant 0 : i32
    %19 = arith.cmpi ne, %18, %c0_i32_15 : i32
    scf.if %19 {
      %c0_16 = arith.constant 0 : index
      %c0_17 = arith.constant 0 : index
      %20 = vector.load %arg8[%c0_16, %c0_17] : memref<16x128xf32, #tpu.memory_space<vmem>>, vector<16x128xf32>
      %c0_18 = arith.constant 0 : index
      %c0_19 = arith.constant 0 : index
      %21 = vector.load %arg6[%c0_18, %c0_19] : memref<1x128xf32, #tpu.memory_space<vmem>>, vector<1x128xf32>
      %22 = vector.broadcast %21 : vector<1x128xf32> to vector<16x128xf32>
      %23 = arith.addf %20, %22 : vector<16x128xf32>
      %c0_20 = arith.constant 0 : index
      %c0_21 = arith.constant 0 : index
      %24 = vector.load %arg7[%c0_20, %c0_21] : memref<16x128xf32, #tpu.memory_space<vmem>>, vector<16x128xf32>
      tpu.vector_store %arg7[%c0_20, %c0_21], %23 {strides = array<i32>} : memref<16x128xf32, #tpu.memory_space<vmem>>, vector<16x128xf32>,
    } else {
    }
    return
  }
  func.func @transform_0(%arg0: i32, %arg1: i32) -> (i32, i32) {
    %c0_i32 = arith.constant 0 : i32
    %c0_i32_0 = arith.constant 0 : i32
    return %arg0, %c0_i32 : i32, i32
  }
  func.func @transform_1(%arg0: i32, %arg1: i32) -> (i32, i32) {
    %c0_i32 = arith.constant 0 : i32
    %c0_i32_0 = arith.constant 0 : i32
    return %arg1, %c0_i32 : i32, i32
  }
  func.func @transform_2(%arg0: i32, %arg1: i32) -> (i32, i32) {
    %c0_i32 = arith.constant 0 : i32
    %c0_i32_0 = arith.constant 0 : i32
    return %c0_i32, %arg1 : i32, i32
  }
  func.func @transform_3(%arg0: i32, %arg1: i32) -> (i32, i32) {
    %c0_i32 = arith.constant 0 : i32
    %c0_i32_0 = arith.constant 0 : i32
    return %c0_i32, %arg1 : i32, i32
  }
  func.func @transform_4(%arg0: i32, %arg1: i32) -> (i32, i32) {
    %c0_i32 = arith.constant 0 : i32
    %c0_i32_0 = arith.constant 0 : i32
    %c0_i32_1 = arith.constant 0 : i32
    return %c0_i32, %c0_i32_0 : i32, i32
  }
  func.func @transform_5(%arg0: i32, %arg1: i32) -> (i32, i32) {
    %c0_i32 = arith.constant 0 : i32
    %c0_i32_0 = arith.constant 0 : i32
    return %arg0, %c0_i32 : i32, i32
  }
}

</mosaic_0001>

<bundles_post_ra>
// kernel: forward_layer.1
= control target key start
LH: loop header
LB: loop body
LE: loop exit
PB: predicated region body
PF: predicated region fallthrough
CT: control target
= control target key end

     0   :  { %s400_s1 = inlined_call_operand.vmem [shape: bf16[128,128], index: 1, kind: input, shape index: {}]   ;;  %s401_s2 = inlined_call_operand.vmem [shape: f32[1,128], index: 2, kind: input, shape index: {}]   ;;  %s402_s3 = inlined_call_operand.vmem [shape: bf16[128,128], index: 3, kind: input, shape index: {}]   ;;  %s403_s0 = inlined_call_operand.vmem [shape: bf16[16,128], index: 0, kind: input, shape index: {}]   ;;  %s404_s4 = inlined_call_operand.vmem [shape: f32[1,128], index: 4, kind: input, shape index: {}]   ;;  %s405_s5 = inlined_call_operand.vmem [shape: f32[16,128], index: 5, kind: output, shape index: {}]  }
   0x1   :  { %v296_v0 = vld [vmem:[%s400_s1 + $0x38] sm:$0xff]  ;;  %v295_v1 = vld [vmem:[%s400_s1 + $0x30] sm:$0xff]  ;;  %v294_v2 = vld [vmem:[%s400_s1 + $0x28] sm:$0xff] }
   0x2   :  { %102 = vmatpush.bf16.xpose.msra.mxu0 %v296_v0  ;;  %v293_v3 = vld [vmem:[%s400_s1 + $0x20] sm:$0xff]  ;;  %v292_v4 = vld [vmem:[%s400_s1 + $0x18] sm:$0xff]  ;;  %v291_v6 = vld [vmem:[%s400_s1 + $0x10] sm:$0xff] }
   0x3   :  { %v304_v5 = vld [vmem:[%s402_s3 + $0x38] sm:$0xff]  ;;  %v303_v7 = vld [vmem:[%s402_s3 + $0x30] sm:$0xff]  ;;  %v290_v8 = vld [vmem:[%s400_s1 + $0x8] sm:$0xff] }
   0x4   :  { %185 = vmatpush.bf16.xpose.msra.mxu1 %v304_v5  ;;  %v302_v9 = vld [vmem:[%s402_s3 + $0x28] sm:$0xff]  ;;  %v289_v10 = vld [vmem:[%s400_s1] sm:$0xff]  ;;  %v300_v13 = vld [vmem:[%s402_s3 + $0x18] sm:$0xff] }
   0x5   :  { %v301_v11 = vld [vmem:[%s402_s3 + $0x20] sm:$0xff]  ;;  %v299_v14 = vld [vmem:[%s402_s3 + $0x10] sm:$0xff]  ;;  %v298_v15 = vld [vmem:[%s402_s3 + $0x8] sm:$0xff] }
   0x6   :  { %v288_v12 = vld [vmem:[%s403_s0] sm:$0xff] }
   0x7   :  { %v297_v16 = vld [vmem:[%s402_s3] sm:$0xff] }
   0x8   :  { %v305_v18 = vld [vmem:[%s401_s2] ss:$0 sm:$0xff] }
   0x9   :  { %v306_v25 = vld [vmem:[%s404_s4] ss:$0 sm:$0xff] }
   0xa   :  { %103 = vmatpush.bf16.xpose.msra.mxu0 %v295_v1 }
   0xc   :  { %186 = vmatpush.bf16.xpose.msra.mxu1 %v303_v7 }
  0x12   :  { %104 = vmatpush.bf16.xpose.msra.mxu0 %v294_v2 }
  0x14   :  { %187 = vmatpush.bf16.xpose.msra.mxu1 %v302_v9 }
  0x1a   :  { %105 = vmatpush.bf16.xpose.msra.mxu0 %v293_v3 }
  0x1c   :  { %188 = vmatpush.bf16.xpose.msra.mxu1 %v301_v11 }
  0x22   :  { %106 = vmatpush.bf16.xpose.msra.mxu0 %v292_v4 }
  0x24   :  { %189 = vmatpush.bf16.xpose.msra.mxu1 %v300_v13 }
  0x2a   :  { %107 = vmatpush.bf16.xpose.msra.mxu0 %v291_v6 }
  0x2c   :  { %190 = vmatpush.bf16.xpose.msra.mxu1 %v299_v14 }
  0x32   :  { %108 = vmatpush.bf16.xpose.msra.mxu0 %v290_v8 }
  0x34   :  { %191 = vmatpush.bf16.xpose.msra.mxu1 %v298_v15 }
  0x3a   :  { %109 = vmatpush.bf16.xpose.msra.mxu0 %v289_v10 }
  0x3c   :  { %192 = vmatpush.bf16.xpose.msra.mxu1 %v297_v16 }
  0x41   :  { %110 = vmatmul.bf16.vlgmr.msra.gmra.mxu0 %v288_v12 }
  0xbe   :  { %v111_v17 = vpop.f32.mrf.mxu0 }
  0xbf   :  { %v112_v19 = vadd.f32 %v305_v18, %v111_v17 }
  0xc1   :  { %v116_v22 = vmax.f32 %v112_v19, 0.0 }
  0xc6   :  { %v113_v20 = vpop.f32.mrf.mxu0 }
  0xc7   :  { %v114_v21 = vadd.f32 %v305_v18, %v113_v20 }
  0xc9   :  { %v117_v23 = vmax.f32 %v114_v21, 0.0 }
  0xcb   :  { %v120_v24 = vpack.c.bf16 %v117_v23, %v116_v22 }
  0xcd   :  { %193 = vmatmul.bf16.vlgmr.msra.gmra.mxu1 %v120_v24 }
 0x14a   :  { %v194_v26 = vpop.f32.mrf.mxu1 }
 0x14b   :  { %v212_v27 = vadd.f32 %v306_v25, %v194_v26 }
 0x14d   :  { %214 = vst [vmem:[%s405_s5] sm:$0xff] %v212_v27 }
 0x152   :  { %v196_v28 = vpop.f32.mrf.mxu1 }
 0x153   :  { %v213_v29 = vadd.f32 %v306_v25, %v196_v28 }
 0x155   :  { %215 = vst [vmem:[%s405_s5 + $0x8] sm:$0xff] %v213_v29 }

</bundles_post_ra>
